<compile_context>
chip_gen: v7x
topology: tpu7x:2x2x1
jax: 0.10.0
libtpu: 0.0.40
codegen_flags: <defaults>
</compile_context>

<pallas_src>
import jax
import jax.numpy as jnp
from jax.experimental import pallas as pl
from jax.experimental.pallas import tpu as pltpu


def _round_up(n, m):
    return ((n + m - 1) // m) * m


def _fc_tcnn_kernel(x_ref, w_ref, b_ref, out_ref):
    # x_ref : (TB, K)    flattened per-sample 2x2 conv patch, K = C*kh*kw = 256
    # w_ref : (K, 10)    folded (conv5 -> fc1) weight, VMEM-resident across steps
    # b_ref : (1, 10)    folded bias (f32)
    # out_ref: (TB, 10)
    y = jnp.dot(x_ref[...], w_ref[...], preferred_element_type=jnp.float32)
    out_ref[...] = (y + b_ref[...]).astype(out_ref.dtype)


def fc_tcnn_forward(x, conv_w, conv_b, fc_w, fc_b, *, block_b=2048):
    """Pallas equivalent of FcTcnnFullConnectedLayer.forward.

    x:       (B, 64, 2, 2)
    conv_w:  (128, 64, 2, 2), conv_b: (128,)
    fc_w:    (10, 128),       fc_b:   (10,)
    returns: (B, 10) float32
    """
    B, C, H, W = x.shape
    O, Cw, KH, KW = conv_w.shape
    assert C == Cw and (H, W) == (KH, KW), (
        "module's view(-1, 128) implies the conv output is 1x1 "
        "(input spatial == kernel size)")
    K = C * KH * KW                    # 256
    F_out = fc_w.shape[0]              # 10

    # --- Wrapper-side algebraic fusion of the two affine layers (tiny matmuls,
    #     done once, outside the hot kernel). Accumulation order changes vs the
    #     unfused module by a few ULPs; validated against the reference below.
    wc = conv_w.reshape(O, K).T.astype(jnp.float32)          # (256, 128)
    wf = fc_w.T.astype(jnp.float32)                          # (128, 10)
    w = wc @ wf                                              # (256, 10)
    b = (conv_b.astype(jnp.float32) @ wf
         + fc_b.astype(jnp.float32)).reshape(1, F_out)       # (1, 10)
    if x.dtype == jnp.bfloat16:
        # bf16 MXU fast path with f32 accumulation; x itself is never cast.
        w = w.astype(jnp.bfloat16)

    # Contiguous reshape only -- no dtype cast, no pad of the big activation.
    x_flat = x.reshape(B, K)                                 # (B, 256)

    # Batch tiling: 8-aligned (sublane rule); cap at block_b but also split the
    # batch so moderate/large B gives >= 2 grid steps (v7x has 2 TensorCores).
    TB = min(block_b, max(8, _round_up(pl.cdiv(B, 2), 8)))
    grid = (pl.cdiv(B, TB),)          # ragged last block masked by Pallas

    out = pl.pallas_call(
        _fc_tcnn_kernel,
        out_shape=jax.ShapeDtypeStruct((B, F_out), jnp.float32),
        grid=grid,
        in_specs=[
            pl.BlockSpec((TB, K), lambda i: (i, 0)),         # x streams over batch
            pl.BlockSpec((K, F_out), lambda i: (0, 0)),      # folded weight, resident
            pl.BlockSpec((1, F_out), lambda i: (0, 0)),      # folded bias, resident
        ],
        out_specs=pl.BlockSpec((TB, F_out), lambda i: (i, 0)),
        compiler_params=pltpu.CompilerParams(
            dimension_semantics=("parallel",),
        ),
    )(x_flat, w, b)

    return out


def _reference_forward(x, conv_w, conv_b, fc_w, fc_b):
    # Pure-JAX reference mirroring the PyTorch module exactly (unfused).
    y = jax.lax.conv_general_dilated(
        x.astype(jnp.float32), conv_w.astype(jnp.float32),
        window_strides=(1, 1), padding="VALID",
        dimension_numbers=("NCHW", "OIHW", "NCHW"))
    y = y + conv_b.reshape(1, -1, 1, 1)
    y = y.reshape(-1, conv_w.shape[0])                       # view(-1, 128)
    return y @ fc_w.T.astype(jnp.float32) + fc_b


if __name__ == "__main__":
    key = jax.random.PRNGKey(0)
    kx, kw1, kb1, kw2, kb2 = jax.random.split(key, 5)

    conv_w = jax.random.normal(kw1, (128, 64, 2, 2), dtype=jnp.float32) * 0.0625
    conv_b = jax.random.normal(kb1, (128,), dtype=jnp.float32) * 0.1
    fc_w = jax.random.normal(kw2, (10, 128), dtype=jnp.float32) * 0.088
    fc_b = jax.random.normal(kb2, (10,), dtype=jnp.float32) * 0.1

    # Main small case (B=2) plus a ragged case (B % TB != 0 with a 2-step grid)
    # to exercise Pallas boundary masking now that the wrapper pad is gone.
    for B in (2, 37):
        x = jax.random.normal(kx, (B, 64, 2, 2), dtype=jnp.float32)
        out = jax.block_until_ready(fc_tcnn_forward(x, conv_w, conv_b, fc_w, fc_b))
        ref = jax.block_until_ready(_reference_forward(x, conv_w, conv_b, fc_w, fc_b))
        assert out.shape == (B, 10), out.shape
        assert jnp.allclose(out, ref, rtol=1e-4, atol=1e-4), (B, out, ref)

    print("KERNEL_OK")
</pallas_src>

<mosaic_0001>
module attributes {stable_mosaic.version = 11 : i64} {
  func.func @_fc_tcnn_kernel(%arg0: i32, %arg1: memref<8x256xf32, #tpu.memory_space<vmem>>, %arg2: memref<256x10xf32, #tpu.memory_space<vmem>>, %arg3: memref<1x10xf32, #tpu.memory_space<vmem>>, %arg4: memref<8x10xf32, #tpu.memory_space<vmem>>) attributes {dimension_semantics = [#tpu.dimension_semantics<parallel>], iteration_bounds = array<i64: 1>, scalar_prefetch = 0 : i64, scratch_operands = 0 : i64, tpu.core_type = #tpu.core_type<tc>, window_params = [{transform_indices = @transform_0, window_bounds = array<i64: 8, 256>}, {pipeline_mode = #tpu.pipeline_mode<synchronous>, transform_indices = @transform_1, window_bounds = array<i64: 256, 10>}, {pipeline_mode = #tpu.pipeline_mode<synchronous>, transform_indices = @transform_2, window_bounds = array<i64: 1, 10>}, {transform_indices = @transform_3, window_bounds = array<i64: 8, 10>}]} {
    %c0 = arith.constant 0 : index
    %c0_0 = arith.constant 0 : index
    %0 = vector.load %arg1[%c0, %c0_0] : memref<8x256xf32, #tpu.memory_space<vmem>>, vector<8x256xf32>
    %c0_1 = arith.constant 0 : index
    %c0_2 = arith.constant 0 : index
    %1 = vector.load %arg2[%c0_1, %c0_2] : memref<256x10xf32, #tpu.memory_space<vmem>>, vector<256x10xf32>
    %cst = arith.constant dense<0.000000e+00> : vector<8x10xf32>
    %2 = tpu.matmul %0, %1, %cst {dimension_numbers = #tpu.dot_dimension_numbers<[1], [0], [0], [1], [0, 0, 1, 1], [], []>} : vector<8x256xf32>, vector<256x10xf32>, vector<8x10xf32> -> vector<8x10xf32>
    %c0_3 = arith.constant 0 : index
    %c0_4 = arith.constant 0 : index
    %3 = vector.load %arg3[%c0_3, %c0_4] : memref<1x10xf32, #tpu.memory_space<vmem>>, vector<1x10xf32>
    %4 = vector.broadcast %3 : vector<1x10xf32> to vector<8x10xf32>
    %5 = arith.addf %2, %4 : vector<8x10xf32>
    %c0_5 = arith.constant 0 : index
    %c0_6 = arith.constant 0 : index
    %6 = vector.load %arg4[%c0_5, %c0_6] : memref<8x10xf32, #tpu.memory_space<vmem>>, vector<8x10xf32>
    tpu.vector_store %arg4[%c0_5, %c0_6], %5 {strides = array<i32>} : memref<8x10xf32, #tpu.memory_space<vmem>>, vector<8x10xf32>,
    return
  }
  func.func @transform_0(%arg0: i32) -> (i32, i32) {
    %c0_i32 = arith.constant 0 : i32
    %c0_i32_0 = arith.constant 0 : i32
    return %arg0, %c0_i32 : i32, i32
  }
  func.func @transform_1(%arg0: i32) -> (i32, i32) {
    %c0_i32 = arith.constant 0 : i32
    %c0_i32_0 = arith.constant 0 : i32
    %c0_i32_1 = arith.constant 0 : i32
    return %c0_i32, %c0_i32_0 : i32, i32
  }
  func.func @transform_2(%arg0: i32) -> (i32, i32) {
    %c0_i32 = arith.constant 0 : i32
    %c0_i32_0 = arith.constant 0 : i32
    %c0_i32_1 = arith.constant 0 : i32
    return %c0_i32, %c0_i32_0 : i32, i32
  }
  func.func @transform_3(%arg0: i32) -> (i32, i32) {
    %c0_i32 = arith.constant 0 : i32
    %c0_i32_0 = arith.constant 0 : i32
    return %arg0, %c0_i32 : i32, i32
  }
}

</mosaic_0001>

<bundles_post_ra>
// kernel: tpu_custom_call.1
= control target key start
LH: loop header
LB: loop body
LE: loop exit
PB: predicated region body
PF: predicated region fallthrough
CT: control target
= control target key end

     0   :  { %8 = vsyncpa [#allocation3], 0  ;;  %vm152_vm0 = vcmask 80896   ;;  %s410_s0 = inlined_call_operand.vmem [shape: f32[2,256], index: 0, kind: input, shape index: {}]   ;;  %s411_s1 = inlined_call_operand.vmem [shape: f32[256,10], index: 1, kind: input, shape index: {}]   ;;  %s412_s2 = inlined_call_operand.vmem [shape: f32[1,10], index: 2, kind: input, shape index: {}]   ;;  %s413_s3 = inlined_call_operand.hbm [shape: f32[2,10], index: 3, kind: output, shape index: {}]  }
   0x1   :  { %v35_v0 = vld [vmem:[%s411_s1 + $0x80] sm:$0xff]  ;;  %v36_v1 = vld [vmem:[%s411_s1 + $0x88] sm:$0xff]  ;;  %v37_v5 = vld [vmem:[%s411_s1 + $0x90] sm:$0xff] }
   0x2   :  { %v206_v2 = vpack.c.bf16 %v36_v1, %v35_v0  ;;  %v19_v3 = vld [vmem:[%s411_s1] sm:$0xff]  ;;  %v20_v4 = vld [vmem:[%s411_s1 + $0x8] sm:$0xff]  ;;  %v38_v7 = vld [vmem:[%s411_s1 + $0x98] sm:$0xff] }
   0x3   :  { %v208_v6 = vpack.c.bf16 %v20_v4, %v19_v3  ;;  %v21_v8 = vld [vmem:[%s411_s1 + $0x10] sm:$0xff]  ;;  %v22_v9 = vld [vmem:[%s411_s1 + $0x18] sm:$0xff]  ;;  %v210_v10 = vpack.c.bf16 %v38_v7, %v37_v5  ;;  %v39_v11 = vld [vmem:[%s411_s1 + $0xa0] sm:$0xff] }
   0x4   :  { %207 = vmatprep.subr.bf16.mxu0 %v206_v2  ;;  %v40_v12 = vld [vmem:[%s411_s1 + $0xa8] sm:$0xff]  ;;  %v212_v13 = vpack.c.bf16 %v22_v9, %v21_v8  ;;  %v23_v15 = vld [vmem:[%s411_s1 + $0x20] sm:$0xff]  ;;  %v41_v17 = vld [vmem:[%s411_s1 + $0xb0] sm:$0xff] }
   0x5   :  { %209 = vmatpush3.bf16.msra.mxu0 %v208_v6  ;;  %v214_v14 = vpack.c.bf16 %v40_v12, %v39_v11  ;;  %v24_v16 = vld [vmem:[%s411_s1 + $0x28] sm:$0xff]  ;;  %v42_v18 = vld [vmem:[%s411_s1 + $0xb8] sm:$0xff]  ;;  %v25_v21 = vld [vmem:[%s411_s1 + $0x30] sm:$0xff] }
   0x6   :  { %211 = vmatprep.subr.bf16.mxu0 %v210_v10  ;;  %v216_v19 = vpack.c.bf16 %v24_v16, %v23_v15  ;;  %v218_v20 = vpack.c.bf16 %v42_v18, %v41_v17  ;;  %v26_v22 = vld [vmem:[%s411_s1 + $0x38] sm:$0xff]  ;;  %v43_v23 = vld [vmem:[%s411_s1 + $0xc0] sm:$0xff]  ;;  %v44_v24 = vld [vmem:[%s411_s1 + $0xc8] sm:$0xff] }
   0x7   :  { %v220_v25 = vpack.c.bf16 %v26_v22, %v25_v21  ;;  %v244_v26 = vld.sshfl [vmem:[%s410_s0] sm:$0xff pattern:$0x76325410]  ;;  %v245_v27 = vld.sshfl [vmem:[%s410_s0 + $0x8] sm:$0xff pattern:$0x76325410]  ;;  %v222_v28 = vpack.c.bf16 %v44_v24, %v43_v23 }
   0x8   :  { %v27_v29 = vld [vmem:[%s411_s1 + $0x40] sm:$0xff]  ;;  %v28_v30 = vld [vmem:[%s411_s1 + $0x48] sm:$0xff]  ;;  %v45_v31 = vld [vmem:[%s411_s1 + $0xd0] sm:$0xff]  ;;  %v79_v34 = vcombine.high %v244_v26, %v245_v27  ;;  %v78_v51 = vcombine.low %v244_v26, %v245_v27 }
   0x9   :  { %213 = vmatpush3.bf16.msra.mxu0 %v212_v13  ;;  %v46_v32 = vld [vmem:[%s411_s1 + $0xd8] sm:$0xff]  ;;  %v224_v33 = vpack.c.bf16 %v28_v30, %v27_v29  ;;  %v29_v36 = vld [vmem:[%s411_s1 + $0x50] sm:$0xff]  ;;  %v47_v38 = vld [vmem:[%s411_s1 + $0xe0] sm:$0xff] }
   0xa   :  { %215 = vmatprep.subr.bf16.mxu0 %v214_v14  ;;  %v226_v35 = vpack.c.bf16 %v46_v32, %v45_v31  ;;  %v30_v37 = vld [vmem:[%s411_s1 + $0x58] sm:$0xff]  ;;  %v48_v39 = vld [vmem:[%s411_s1 + $0xe8] sm:$0xff]  ;;  %146 = vmatprep.mubr.f32.mxu0 %v79_v34  ;;  %v31_v42 = vld [vmem:[%s411_s1 + $0x60] sm:$0xff] }
   0xb   :  { %v228_v40 = vpack.c.bf16 %v30_v37, %v29_v36  ;;  %v230_v41 = vpack.c.bf16 %v48_v39, %v47_v38  ;;  %v32_v43 = vld [vmem:[%s411_s1 + $0x68] sm:$0xff]  ;;  %v49_v44 = vld [vmem:[%s411_s1 + $0xf0] sm:$0xff]  ;;  %v50_v45 = vld [vmem:[%s411_s1 + $0xf8] sm:$0xff] }
   0xc   :  { %v232_v46 = vpack.c.bf16 %v32_v43, %v31_v42  ;;  %v234_v47 = vpack.c.bf16 %v50_v45, %v49_v44  ;;  %v33_v48 = vld [vmem:[%s411_s1 + $0x70] sm:$0xff]  ;;  %v34_v49 = vld [vmem:[%s411_s1 + $0x78] sm:$0xff]  ;;  %v170_v53 = vld [vmem:[%s412_s2] ss:$0 sm:$0xff] }
   0xd   :  { %217 = vmatpush3.bf16.msra.mxu0 %v216_v19  ;;  %v236_v50 = vpack.c.bf16 %v34_v49, %v33_v48 }
   0xe   :  { %219 = vmatprep.subr.bf16.mxu0 %v218_v20 }
  0x11   :  { %221 = vmatpush3.bf16.msra.mxu0 %v220_v25 }
  0x12   :  { %223 = vmatprep.subr.bf16.mxu0 %v222_v28 }
  0x15   :  { %225 = vmatpush3.bf16.msra.mxu0 %v224_v33 }
  0x16   :  { %227 = vmatprep.subr.bf16.mxu0 %v226_v35 }
  0x19   :  { %229 = vmatpush3.bf16.msra.mxu0 %v228_v40 }
  0x1a   :  { %231 = vmatprep.subr.bf16.mxu0 %v230_v41 }
  0x1d   :  { %233 = vmatpush3.bf16.msra.mxu0 %v232_v46 }
  0x1e   :  { %235 = vmatprep.subr.bf16.mxu0 %v234_v47 }
  0x21   :  { %237 = vmatpush3.bf16.msra.mxu0 %v236_v50 }
  0x24   :  { %147 = vmatmul.mubr.f32.vlgmr.msra.gmra.mrb[0].mxu0 %v78_v51 }
  0xf7   :  { %v203_v52 = vpop.f32.mrb[0].mxu0 }
  0xf8   :  { %v204_v54 = vpop.f32.mrb[1].mxu0 }
  0xf9   :  { %v205_v55 = vadd.f32 %v204_v54, %v203_v52 }
  0xfb   :  { %v149_v56 = vadd.f32 %v205_v55, %v170_v53 }
  0xfd   :  { %153 = vst.msk [vmem:[#allocation2] sm:$0xff] %vm152_vm0, %v149_v56 }
  0xfe   :  { %158 = vsyncadd [#allocation3], 96  ;;  %s270_s27 = smov [#allocation2]  }
  0xff   :  { %s159_s28 = sshll.u32 %s270_s27, 4  ;;  %s160_s28 = int_to_ptr.vmem [resolvable:$true] %s159_s28 }
 0x100   :  { %s246_s1 = scalar_lea.vmem %s160_s28, 32  ;;  %s250_s29 = scalar_lea.vmem %s160_s28, 128 }
 0x101   :  { %p247_p0 = scmp.ne.s32.totalorder %s160_s28, %s246_s1  ;;  %p251_p1 = scmp.lt.s32.totalorder %s160_s28, %s160_s28 }
 0x102   :  { %p252_p2 = scmp.lt.s32.totalorder %s250_s29, %s246_s1 }
 0x104   :  { %p253_p3 = por %p252_p2, %p251_p1 }
 0x106   :  { %p254_p4 = pnand %p253_p3, %p247_p0 }
 0x108   :  { %257 = shalt.err (!%p254_p4)
}
 0x109   :  { %s258_s2 = scalar_lea.hbm %s413_s3, 32 }
 0x10a   :  { %p259_p5 = scmp.ne.s32.totalorder %s413_s3, %s258_s2  ;;  %p262_p6 = scmp.lt.u32.totalorder %s258_s2, %s413_s3 }
 0x10c   :  { %p264_p7 = pnand %p262_p6, %p259_p5 }
 0x10e   :  { %267 = shalt.err (!%p264_p7)
}
 0x10f   :  { %s271_s8 = smov 32   ;;  %s272_s9 = smov 2  }
 0x110   :  { %165 = dma.vmem_to_hbm [thread:$0]  %s160_s28, 32, %s413_s3, [#allocation3], %s271_s8, %s271_s8, %s272_s9  }
 0x111   :  { %268 = dma.done.wait [#allocation3], 128  }
 0x112   :  { %269 = vsyncadd [#allocation3], 4294967168 }
 0x113   :  { %169 = vsyncpa [#allocation3], 1 }

</bundles_post_ra>
